<compile_context>
chip_gen: v6e
topology: v6e:2x2x1
jax: 0.10.0
libtpu: 0.0.40
codegen_flags: <defaults>
</compile_context>

<pallas_src>
import math
import numpy as np
import jax
import jax.numpy as jnp
from jax.experimental import pallas as pl
from jax.experimental.pallas import tpu as pltpu


def _gelu_erf(x):
    # exact GELU: 0.5*x*(1+erf(x/sqrt(2))); erf via Abramowitz & Stegun 7.1.26 (|err| < 1.5e-7).
    # The 1/(1+p*a) rational term goes to the EUP via the approximate reciprocal (free slot).
    z = x * 0.7071067811865476
    a = jnp.abs(z)
    t = pl.reciprocal(1.0 + 0.3275911 * a, approx=True)
    poly = t * (0.254829592 + t * (-0.284496736 + t * (1.421413741
             + t * (-1.453152027 + t * 1.061405429))))
    erf_a = 1.0 - poly * jnp.exp(-a * a)
    erf_z = jnp.where(z >= 0.0, erf_a, -erf_a)
    return 0.5 * x * (1.0 + erf_z)


def _make_kernel(c_out, w, hb):
    l = hb * w

    def kernel(x_ref, halo_ref, wa_ref, wb_ref, wc_ref, wd_ref,
               s_ref, t_ref, m_ref, o_ref):
        # x_ref    : (1, Cin, L)      input row-slab, spatial flattened onto lanes (L = hb*W)
        # halo_ref : (1, 1, Cin, W)   first input row of the next slab (zeros for the last slab)
        # wa..wd   : tap groups for the x[a,b] / x[a,b+1] / x[a+1,b] / x[a+1,b+1] views
        # s_ref    : (Cout, 1)        fused BN scale
        # t_ref    : (Cout, 1)        fused conv-bias + BN shift
        # m_ref    : (1, L)           column mask, 0.0 where b == W-1
        # o_ref    : (1, 4, Cout, L)  parity-planar output planes (ee, eo, oe, oo)
        x00 = x_ref[0]                                   # (Cin, L)
        halo = halo_ref[0, 0]                            # (Cin, W)
        mcol = m_ref[...]                                 # (1, L)

        # Shifted input views.  Column (+1): XLU lane rotation + mask (wrapped b == W-1 lanes
        # are zeroed).  Row (+1): drop the first row of the slab, append the 1-row halo.
        x01 = pltpu.roll(x00, shift=l - 1, axis=1) * mcol
        x10 = jnp.concatenate([x00[:, w:], halo], axis=1)
        x11 = pltpu.roll(x10, shift=l - 1, axis=1) * mcol

        # 4 dense accumulating MXU dots (9 taps total; no zero-padded weight blocks, no
        # materialized 4*Cin slab).  Channels on sublanes, spatial on lanes (lane-dense output).
        ya = jnp.dot(wa_ref[...], x00, preferred_element_type=jnp.float32)   # -> ee, eo, oe, oo
        yb = jnp.dot(wb_ref[...], x01, preferred_element_type=jnp.float32)   # -> eo, oo
        yc = jnp.dot(wc_ref[...], x10, preferred_element_type=jnp.float32)   # -> oe, oo
        yd = jnp.dot(wd_ref[...], x11, preferred_element_type=jnp.float32)   # -> oo

        c = c_out
        y_ee = ya[0 * c:1 * c]
        y_eo = ya[1 * c:2 * c] + yb[0 * c:1 * c]
        y_oe = ya[2 * c:3 * c] + yc[0 * c:1 * c]
        y_oo = ya[3 * c:4 * c] + yb[1 * c:2 * c] + yc[1 * c:2 * c] + yd

        scale = s_ref[...]
        shift = t_ref[...]
        o_ref[0, 0] = _gelu_erf(y_ee * scale + shift).astype(o_ref.dtype)
        o_ref[0, 1] = _gelu_erf(y_eo * scale + shift).astype(o_ref.dtype)
        o_ref[0, 2] = _gelu_erf(y_oe * scale + shift).astype(o_ref.dtype)
        o_ref[0, 3] = _gelu_erf(y_oo * scale + shift).astype(o_ref.dtype)

    return kernel


def _pick_row_slab(n, h, w, c_in, c_out, bytes_in, bytes_out):
    """Row-slab height: lane-aligned blocks, v7x-safe VMEM, as much grid depth as available."""
    cands = [d for d in range(1, h + 1) if h % d == 0 and (d * w) % 128 == 0]
    if not cands:
        cands = [h]                                   # full-extent block (always legal)

    def footprint(hb):                                # double-buffered in + out blocks
        l = hb * w
        return 2 * c_in * l * bytes_in + 2 * 4 * c_out * l * bytes_out

    ok = [d for d in cands if footprint(d) <= 12 * 1024 * 1024]
    if not ok:
        ok = [min(cands)]
    # prefer >= 8 total grid steps (pipeline depth), then the widest (lane-dense) slab
    return max(ok, key=lambda d: (min(n * (h // d), 8), d))


def upsampler_block(x_nchw, w_t, bias, gamma, beta, run_mean, run_var, eps=1e-3,
                    compute_dtype=jnp.float32, out_dtype=jnp.float32):
    """x_nchw: (N, Cin, H, W); w_t: ConvTranspose2d weight (Cin, Cout, 3, 3)."""
    n, c_in, h, w = x_nchw.shape
    c_out = w_t.shape[1]
    hw = h * w

    bytes_in = jnp.dtype(compute_dtype).itemsize
    bytes_out = jnp.dtype(out_dtype).itemsize
    hb = _pick_row_slab(n, h, w, c_in, c_out, bytes_in, bytes_out)
    n_slabs = h // hb
    l = hb * w

    xc = x_nchw.astype(compute_dtype)
    x = xc.reshape(n, c_in, hw)                                  # free reshape, stays NCHW

    # 1-row halo per slab: first row of the next slab (zeros for the last slab).
    halo = jnp.zeros((n, n_slabs, c_in, w), compute_dtype)
    if n_slabs > 1:
        nxt = xc[:, :, hb::hb, :]                                # (N, Cin, n_slabs-1, W)
        halo = halo.at[:, :n_slabs - 1].set(jnp.transpose(nxt, (0, 2, 1, 3)))

    # Polyphase tap mapping (y[co, 2a+p, 2b+q]):
    #   ee: x[a,b]*w11
    #   eo: x[a,b]*w12 + x[a,b+1]*w10
    #   oe: x[a,b]*w21 + x[a+1,b]*w01
    #   oo: x[a,b]*w22 + x[a,b+1]*w20 + x[a+1,b]*w02 + x[a+1,b+1]*w00
    wt = w_t.astype(jnp.float32)

    def tap(ky, kx):                                             # (Cout, Cin)
        return jnp.transpose(wt[:, :, ky, kx], (1, 0))

    w_a = jnp.concatenate([tap(1, 1), tap(1, 2), tap(2, 1), tap(2, 2)], axis=0)  # x00 -> ee,eo,oe,oo
    w_b = jnp.concatenate([tap(1, 0), tap(2, 0)], axis=0)                        # x01 -> eo,oo
    w_c = jnp.concatenate([tap(0, 1), tap(0, 2)], axis=0)                        # x10 -> oe,oo
    w_d = tap(0, 0)                                                              # x11 -> oo
    w_a, w_b, w_c, w_d = (m.astype(compute_dtype) for m in (w_a, w_b, w_c, w_d))

    # Fold conv bias + eval-mode BatchNorm into per-channel scale/shift.
    inv = gamma.astype(jnp.float32) / jnp.sqrt(run_var.astype(jnp.float32) + eps)
    shift = (bias.astype(jnp.float32) - run_mean.astype(jnp.float32)) * inv + beta.astype(jnp.float32)
    scale = inv.reshape(c_out, 1)
    shift = shift.reshape(c_out, 1)

    # Column-edge mask: zeroes the wrapped b == W-1 lanes of the +1-column shifted views.
    col = np.arange(l) % w
    mcol = jnp.asarray((col != w - 1).astype(np.float32), dtype=compute_dtype).reshape(1, l)

    flops = 2 * 9 * n * c_out * c_in * hw                         # 9 real taps, no zero blocks
    bytes_accessed = ((n * c_in * hw + n * n_slabs * c_in * w + 9 * c_in * c_out) * bytes_in
                      + n * 4 * c_out * hw * bytes_out)
    cost = pl.CostEstimate(flops=int(flops),
                           transcendentals=int(2 * n * 4 * c_out * hw),
                           bytes_accessed=int(bytes_accessed))

    grid = (n, n_slabs)
    out_planar = pl.pallas_call(
        _make_kernel(c_out, w, hb),
        out_shape=jax.ShapeDtypeStruct((n, 4, c_out, hw), out_dtype),
        grid=grid,
        in_specs=[
            pl.BlockSpec((1, c_in, l), lambda i, j: (i, 0, j)),          # x row-slab
            pl.BlockSpec((1, 1, c_in, w), lambda i, j: (i, j, 0, 0)),    # 1-row halo
            pl.BlockSpec((4 * c_out, c_in), lambda i, j: (0, 0)),        # taps for x00
            pl.BlockSpec((2 * c_out, c_in), lambda i, j: (0, 0)),        # taps for x01
            pl.BlockSpec((2 * c_out, c_in), lambda i, j: (0, 0)),        # taps for x10
            pl.BlockSpec((c_out, c_in), lambda i, j: (0, 0)),            # tap for x11
            pl.BlockSpec((c_out, 1), lambda i, j: (0, 0)),               # BN scale
            pl.BlockSpec((c_out, 1), lambda i, j: (0, 0)),               # bias + BN shift
            pl.BlockSpec((1, l), lambda i, j: (0, 0)),                   # column mask
        ],
        out_specs=pl.BlockSpec((1, 4, c_out, l), lambda i, j: (i, 0, 0, j)),
        compiler_params=pltpu.CompilerParams(
            dimension_semantics=("parallel", "parallel"),
            vmem_limit_bytes=48 * 1024 * 1024),                          # explicit; v7x-safe
        cost_estimate=cost,
    )(x, halo, w_a, w_b, w_c, w_d, scale, shift, mcol)

    # De-interleave parity planes: (n, (p,q), co, a*W+b) -> (n, co, 2a+p, 2b+q).
    out = out_planar.reshape(n, 2, 2, c_out, h, w)
    out = jnp.transpose(out, (0, 3, 4, 1, 5, 2)).reshape(n, c_out, 2 * h, 2 * w)
    return out


def _reference_numpy(x, w_t, bias, gamma, beta, rmean, rvar, eps=1e-3):
    """Direct (scatter-style) ConvTranspose2d + eval-mode BN + exact GELU."""
    x = np.asarray(x, np.float64)
    w_t = np.asarray(w_t, np.float64)
    n, c_in, h, w = x.shape
    c_out = w_t.shape[1]
    full = np.zeros((n, c_out, 2 * h + 1, 2 * w + 1), np.float64)
    for ky in range(3):
        for kx in range(3):
            contrib = np.einsum('ncij,cd->ndij', x, w_t[:, :, ky, kx])
            full[:, :, ky:ky + 2 * h:2, kx:kx + 2 * w:2] += contrib
    out = full[:, :, 1:1 + 2 * h, 1:1 + 2 * w] + np.asarray(bias)[None, :, None, None]
    inv = np.asarray(gamma) / np.sqrt(np.asarray(rvar) + eps)
    out = (out - np.asarray(rmean)[None, :, None, None]) * inv[None, :, None, None] \
        + np.asarray(beta)[None, :, None, None]
    erf = np.vectorize(math.erf)
    return 0.5 * out * (1.0 + erf(out / math.sqrt(2.0)))


if __name__ == "__main__":
    N, C_IN, C_OUT, H, W = 2, 4, 8, 16, 16
    key = jax.random.PRNGKey(0)
    ks = jax.random.split(key, 7)

    x = jax.random.normal(ks[0], (N, C_IN, H, W), jnp.float32)
    w_t = 0.3 * jax.random.normal(ks[1], (C_IN, C_OUT, 3, 3), jnp.float32)   # ConvTranspose2d weight
    bias = 0.1 * jax.random.normal(ks[2], (C_OUT,), jnp.float32)
    gamma = 1.0 + 0.1 * jax.random.normal(ks[3], (C_OUT,), jnp.float32)
    beta = 0.1 * jax.random.normal(ks[4], (C_OUT,), jnp.float32)
    run_mean = 0.05 * jax.random.normal(ks[5], (C_OUT,), jnp.float32)
    run_var = jnp.abs(1.0 + 0.1 * jax.random.normal(ks[6], (C_OUT,), jnp.float32))

    ref = _reference_numpy(x, w_t, bias, gamma, beta, run_mean, run_var, eps=1e-3)

    # fp32 compute path (tolerance dominated by the EUP approx-reciprocal in the erf polynomial).
    out_f32 = upsampler_block(x, w_t, bias, gamma, beta, run_mean, run_var, eps=1e-3,
                              compute_dtype=jnp.float32, out_dtype=jnp.float32)
    out_f32 = jax.block_until_ready(out_f32)
    np.testing.assert_allclose(np.asarray(out_f32), ref, rtol=1e-2, atol=5e-3)

    # bf16 compute path (halves input HBM traffic / bf16-native MXU); looser tolerance.
    out_bf16 = upsampler_block(x, w_t, bias, gamma, beta, run_mean, run_var, eps=1e-3,
                               compute_dtype=jnp.bfloat16, out_dtype=jnp.float32)
    out_bf16 = jax.block_until_ready(out_bf16)
    np.testing.assert_allclose(np.asarray(out_bf16), ref, rtol=6e-2, atol=4e-2)

    print("KERNEL_OK")
</pallas_src>

<mosaic_0001>
module attributes {stable_mosaic.version = 11 : i64} {
  func.func @kernel(%arg0: i32, %arg1: i32, %arg2: memref<1x4x128xf32, #tpu.memory_space<vmem>>, %arg3: memref<1x1x4x16xf32, #tpu.memory_space<vmem>>, %arg4: memref<32x4xf32, #tpu.memory_space<vmem>>, %arg5: memref<16x4xf32, #tpu.memory_space<vmem>>, %arg6: memref<16x4xf32, #tpu.memory_space<vmem>>, %arg7: memref<8x4xf32, #tpu.memory_space<vmem>>, %arg8: memref<8x1xf32, #tpu.memory_space<vmem>>, %arg9: memref<8x1xf32, #tpu.memory_space<vmem>>, %arg10: memref<1x128xf32, #tpu.memory_space<vmem>>, %arg11: memref<1x4x8x128xf32, #tpu.memory_space<vmem>>) attributes {dimension_semantics = [#tpu.dimension_semantics<parallel>, #tpu.dimension_semantics<parallel>], iteration_bounds = array<i64: 2, 2>, scalar_prefetch = 0 : i64, scratch_operands = 0 : i64, tpu.core_type = #tpu.core_type<tc>, window_params = [{transform_indices = @transform_0, window_bounds = array<i64: 1, 4, 128>}, {transform_indices = @transform_1, window_bounds = array<i64: 1, 1, 4, 16>}, {pipeline_mode = #tpu.pipeline_mode<synchronous>, transform_indices = @transform_2, window_bounds = array<i64: 32, 4>}, {pipeline_mode = #tpu.pipeline_mode<synchronous>, transform_indices = @transform_3, window_bounds = array<i64: 16, 4>}, {pipeline_mode = #tpu.pipeline_mode<synchronous>, transform_indices = @transform_4, window_bounds = array<i64: 16, 4>}, {pipeline_mode = #tpu.pipeline_mode<synchronous>, transform_indices = @transform_5, window_bounds = array<i64: 8, 4>}, {pipeline_mode = #tpu.pipeline_mode<synchronous>, transform_indices = @transform_6, window_bounds = array<i64: 8, 1>}, {pipeline_mode = #tpu.pipeline_mode<synchronous>, transform_indices = @transform_7, window_bounds = array<i64: 8, 1>}, {pipeline_mode = #tpu.pipeline_mode<synchronous>, transform_indices = @transform_8, window_bounds = array<i64: 1, 128>}, {transform_indices = @transform_9, window_bounds = array<i64: 1, 4, 8, 128>}]} {
    %c0 = arith.constant 0 : index
    %c0_0 = arith.constant 0 : index
    %c0_1 = arith.constant 0 : index
    %0 = vector.load %arg2[%c0, %c0_0, %c0_1] : memref<1x4x128xf32, #tpu.memory_space<vmem>>, vector<1x4x128xf32>
    %1 = vector.shape_cast %0 : vector<1x4x128xf32> to vector<4x128xf32>
    %c0_2 = arith.constant 0 : index
    %c0_3 = arith.constant 0 : index
    %c0_4 = arith.constant 0 : index
    %c0_5 = arith.constant 0 : index
    %2 = vector.load %arg3[%c0_2, %c0_3, %c0_4, %c0_5] : memref<1x1x4x16xf32, #tpu.memory_space<vmem>>, vector<1x1x4x16xf32>
    %3 = vector.shape_cast %2 : vector<1x1x4x16xf32> to vector<4x16xf32>
    %c0_6 = arith.constant 0 : index
    %c0_7 = arith.constant 0 : index
    %4 = vector.load %arg10[%c0_6, %c0_7] : memref<1x128xf32, #tpu.memory_space<vmem>>, vector<1x128xf32>
    %c127_i32 = arith.constant 127 : i32
    %5 = tpu.dynamic_rotate %1 by %c127_i32 dim 1 : vector<4x128xf32>, i32 -> vector<4x128xf32>
    %6 = vector.broadcast %4 : vector<1x128xf32> to vector<4x128xf32>
    %7 = arith.mulf %5, %6 : vector<4x128xf32>
    %8 = vector.extract_strided_slice %1 {offsets = [0, 16], sizes = [4, 112], strides = [1, 1]} : vector<4x128xf32> to vector<4x112xf32>
    %9 = tpu.concatenate %8, %3 in 1 : vector<4x112xf32>, vector<4x16xf32> -> vector<4x128xf32>
    %c127_i32_8 = arith.constant 127 : i32
    %10 = tpu.dynamic_rotate %9 by %c127_i32_8 dim 1 : vector<4x128xf32>, i32 -> vector<4x128xf32>
    %11 = vector.broadcast %4 : vector<1x128xf32> to vector<4x128xf32>
    %12 = arith.mulf %10, %11 : vector<4x128xf32>
    %c0_9 = arith.constant 0 : index
    %c0_10 = arith.constant 0 : index
    %13 = vector.load %arg4[%c0_9, %c0_10] : memref<32x4xf32, #tpu.memory_space<vmem>>, vector<32x4xf32>
    %cst = arith.constant dense<0.000000e+00> : vector<32x128xf32>
    %14 = tpu.matmul %13, %1, %cst {dimension_numbers = #tpu.dot_dimension_numbers<[1], [0], [0], [1], [0, 0, 1, 1], [], []>} : vector<32x4xf32>, vector<4x128xf32>, vector<32x128xf32> -> vector<32x128xf32>
    %c0_11 = arith.constant 0 : index
    %c0_12 = arith.constant 0 : index
    %15 = vector.load %arg5[%c0_11, %c0_12] : memref<16x4xf32, #tpu.memory_space<vmem>>, vector<16x4xf32>
    %cst_13 = arith.constant dense<0.000000e+00> : vector<16x128xf32>
    %16 = tpu.matmul %15, %7, %cst_13 {dimension_numbers = #tpu.dot_dimension_numbers<[1], [0], [0], [1], [0, 0, 1, 1], [], []>} : vector<16x4xf32>, vector<4x128xf32>, vector<16x128xf32> -> vector<16x128xf32>
    %c0_14 = arith.constant 0 : index
    %c0_15 = arith.constant 0 : index
    %17 = vector.load %arg6[%c0_14, %c0_15] : memref<16x4xf32, #tpu.memory_space<vmem>>, vector<16x4xf32>
    %cst_16 = arith.constant dense<0.000000e+00> : vector<16x128xf32>
    %18 = tpu.matmul %17, %9, %cst_16 {dimension_numbers = #tpu.dot_dimension_numbers<[1], [0], [0], [1], [0, 0, 1, 1], [], []>} : vector<16x4xf32>, vector<4x128xf32>, vector<16x128xf32> -> vector<16x128xf32>
    %c0_17 = arith.constant 0 : index
    %c0_18 = arith.constant 0 : index
    %19 = vector.load %arg7[%c0_17, %c0_18] : memref<8x4xf32, #tpu.memory_space<vmem>>, vector<8x4xf32>
    %cst_19 = arith.constant dense<0.000000e+00> : vector<8x128xf32>
    %20 = tpu.matmul %19, %12, %cst_19 {dimension_numbers = #tpu.dot_dimension_numbers<[1], [0], [0], [1], [0, 0, 1, 1], [], []>} : vector<8x4xf32>, vector<4x128xf32>, vector<8x128xf32> -> vector<8x128xf32>
    %21 = vector.extract_strided_slice %14 {offsets = [0, 0], sizes = [8, 128], strides = [1, 1]} : vector<32x128xf32> to vector<8x128xf32>
    %22 = vector.extract_strided_slice %14 {offsets = [8, 0], sizes = [8, 128], strides = [1, 1]} : vector<32x128xf32> to vector<8x128xf32>
    %23 = vector.extract_strided_slice %16 {offsets = [0, 0], sizes = [8, 128], strides = [1, 1]} : vector<16x128xf32> to vector<8x128xf32>
    %24 = arith.addf %22, %23 : vector<8x128xf32>
    %25 = vector.extract_strided_slice %14 {offsets = [16, 0], sizes = [8, 128], strides = [1, 1]} : vector<32x128xf32> to vector<8x128xf32>
    %26 = vector.extract_strided_slice %18 {offsets = [0, 0], sizes = [8, 128], strides = [1, 1]} : vector<16x128xf32> to vector<8x128xf32>
    %27 = arith.addf %25, %26 : vector<8x128xf32>
    %28 = vector.extract_strided_slice %14 {offsets = [24, 0], sizes = [8, 128], strides = [1, 1]} : vector<32x128xf32> to vector<8x128xf32>
    %29 = vector.extract_strided_slice %16 {offsets = [8, 0], sizes = [8, 128], strides = [1, 1]} : vector<16x128xf32> to vector<8x128xf32>
    %30 = arith.addf %28, %29 : vector<8x128xf32>
    %31 = vector.extract_strided_slice %18 {offsets = [8, 0], sizes = [8, 128], strides = [1, 1]} : vector<16x128xf32> to vector<8x128xf32>
    %32 = arith.addf %30, %31 : vector<8x128xf32>
    %33 = arith.addf %32, %20 : vector<8x128xf32>
    %c0_20 = arith.constant 0 : index
    %c0_21 = arith.constant 0 : index
    %34 = vector.load %arg8[%c0_20, %c0_21] : memref<8x1xf32, #tpu.memory_space<vmem>>, vector<8x1xf32>
    %c0_22 = arith.constant 0 : index
    %c0_23 = arith.constant 0 : index
    %35 = vector.load %arg9[%c0_22, %c0_23] : memref<8x1xf32, #tpu.memory_space<vmem>>, vector<8x1xf32>
    %36 = vector.broadcast %34 : vector<8x1xf32> to vector<8x128xf32>
    %37 = arith.mulf %21, %36 : vector<8x128xf32>
    %38 = vector.broadcast %35 : vector<8x1xf32> to vector<8x128xf32>
    %39 = arith.addf %37, %38 : vector<8x128xf32>
    %cst_24 = arith.constant 0.707106769 : f32
    %40 = vector.broadcast %cst_24 : f32 to vector<8x128xf32>
    %41 = arith.mulf %39, %40 : vector<8x128xf32>
    %42 = math.absf %41 : vector<8x128xf32>
    %cst_25 = arith.constant 0.327591091 : f32
    %43 = vector.broadcast %cst_25 : f32 to vector<8x128xf32>
    %44 = arith.mulf %43, %42 : vector<8x128xf32>
    %cst_26 = arith.constant 1.000000e+00 : f32
    %45 = vector.broadcast %cst_26 : f32 to vector<8x128xf32>
    %46 = arith.addf %45, %44 : vector<8x128xf32>
    %47 = tpu.reciprocal %46 {approx = true} : vector<8x128xf32> -> vector<8x128xf32>
    %cst_27 = arith.constant 1.06140542 : f32
    %48 = vector.broadcast %cst_27 : f32 to vector<8x128xf32>
    %49 = arith.mulf %47, %48 : vector<8x128xf32>
    %cst_28 = arith.constant -1.45315206 : f32
    %50 = vector.broadcast %cst_28 : f32 to vector<8x128xf32>
    %51 = arith.addf %50, %49 : vector<8x128xf32>
    %52 = arith.mulf %47, %51 : vector<8x128xf32>
    %cst_29 = arith.constant 1.42141378 : f32
    %53 = vector.broadcast %cst_29 : f32 to vector<8x128xf32>
    %54 = arith.addf %53, %52 : vector<8x128xf32>
    %55 = arith.mulf %47, %54 : vector<8x128xf32>
    %cst_30 = arith.constant -0.284496725 : f32
    %56 = vector.broadcast %cst_30 : f32 to vector<8x128xf32>
    %57 = arith.addf %56, %55 : vector<8x128xf32>
    %58 = arith.mulf %47, %57 : vector<8x128xf32>
    %cst_31 = arith.constant 0.254829586 : f32
    %59 = vector.broadcast %cst_31 : f32 to vector<8x128xf32>
    %60 = arith.addf %59, %58 : vector<8x128xf32>
    %61 = arith.mulf %47, %60 : vector<8x128xf32>
    %cst_32 = arith.constant 0.000000e+00 : f32
    %62 = vector.broadcast %cst_32 : f32 to vector<8x128xf32>
    %63 = arith.subf %62, %42 : vector<8x128xf32>
    %64 = arith.mulf %63, %42 : vector<8x128xf32>
    %65 = math.exp %64 : vector<8x128xf32>
    %66 = arith.mulf %61, %65 : vector<8x128xf32>
    %cst_33 = arith.constant 1.000000e+00 : f32
    %67 = vector.broadcast %cst_33 : f32 to vector<8x128xf32>
    %68 = arith.subf %67, %66 : vector<8x128xf32>
    %cst_34 = arith.constant 0.000000e+00 : f32
    %69 = vector.broadcast %cst_34 : f32 to vector<8x128xf32>
    %70 = arith.cmpf oge, %41, %69 : vector<8x128xf32>
    %cst_35 = arith.constant 0.000000e+00 : f32
    %71 = vector.broadcast %cst_35 : f32 to vector<8x128xf32>
    %72 = arith.subf %71, %68 : vector<8x128xf32>
    %73 = arith.select %70, %68, %72 : vector<8x128xi1>, vector<8x128xf32>
    %cst_36 = arith.constant 5.000000e-01 : f32
    %74 = vector.broadcast %cst_36 : f32 to vector<8x128xf32>
    %75 = arith.mulf %74, %39 : vector<8x128xf32>
    %cst_37 = arith.constant 1.000000e+00 : f32
    %76 = vector.broadcast %cst_37 : f32 to vector<8x128xf32>
    %77 = arith.addf %76, %73 : vector<8x128xf32>
    %78 = arith.mulf %75, %77 : vector<8x128xf32>
    %c0_38 = arith.constant 0 : index
    %c0_39 = arith.constant 0 : index
    %c0_40 = arith.constant 0 : index
    %c0_41 = arith.constant 0 : index
    %79 = vector.load %arg11[%c0_38, %c0_39, %c0_40, %c0_41] : memref<1x4x8x128xf32, #tpu.memory_space<vmem>>, vector<1x1x8x128xf32>
    %80 = vector.shape_cast %79 : vector<1x1x8x128xf32> to vector<8x128xf32>
    %81 = vector.shape_cast %78 : vector<8x128xf32> to vector<1x1x8x128xf32>
    tpu.vector_store %arg11[%c0_38, %c0_39, %c0_40, %c0_41], %81 {strides = array<i32>} : memref<1x4x8x128xf32, #tpu.memory_space<vmem>>, vector<1x1x8x128xf32>,
    %82 = vector.broadcast %34 : vector<8x1xf32> to vector<8x128xf32>
    %83 = arith.mulf %24, %82 : vector<8x128xf32>
    %84 = vector.broadcast %35 : vector<8x1xf32> to vector<8x128xf32>
    %85 = arith.addf %83, %84 : vector<8x128xf32>
    %cst_42 = arith.constant 0.707106769 : f32
    %86 = vector.broadcast %cst_42 : f32 to vector<8x128xf32>
    %87 = arith.mulf %85, %86 : vector<8x128xf32>
    %88 = math.absf %87 : vector<8x128xf32>
    %cst_43 = arith.constant 0.327591091 : f32
    %89 = vector.broadcast %cst_43 : f32 to vector<8x128xf32>
    %90 = arith.mulf %89, %88 : vector<8x128xf32>
    %cst_44 = arith.constant 1.000000e+00 : f32
    %91 = vector.broadcast %cst_44 : f32 to vector<8x128xf32>
    %92 = arith.addf %91, %90 : vector<8x128xf32>
    %93 = tpu.reciprocal %92 {approx = true} : vector<8x128xf32> -> vector<8x128xf32>
    %cst_45 = arith.constant 1.06140542 : f32
    %94 = vector.broadcast %cst_45 : f32 to vector<8x128xf32>
    %95 = arith.mulf %93, %94 : vector<8x128xf32>
    %cst_46 = arith.constant -1.45315206 : f32
    %96 = vector.broadcast %cst_46 : f32 to vector<8x128xf32>
    %97 = arith.addf %96, %95 : vector<8x128xf32>
    %98 = arith.mulf %93, %97 : vector<8x128xf32>
    %cst_47 = arith.constant 1.42141378 : f32
    %99 = vector.broadcast %cst_47 : f32 to vector<8x128xf32>
    %100 = arith.addf %99, %98 : vector<8x128xf32>
    %101 = arith.mulf %93, %100 : vector<8x128xf32>
    %cst_48 = arith.constant -0.284496725 : f32
    %102 = vector.broadcast %cst_48 : f32 to vector<8x128xf32>
    %103 = arith.addf %102, %101 : vector<8x128xf32>
    %104 = arith.mulf %93, %103 : vector<8x128xf32>
    %cst_49 = arith.constant 0.254829586 : f32
    %105 = vector.broadcast %cst_49 : f32 to vector<8x128xf32>
    %106 = arith.addf %105, %104 : vector<8x128xf32>
    %107 = arith.mulf %93, %106 : vector<8x128xf32>
    %cst_50 = arith.constant 0.000000e+00 : f32
    %108 = vector.broadcast %cst_50 : f32 to vector<8x128xf32>
    %109 = arith.subf %108, %88 : vector<8x128xf32>
    %110 = arith.mulf %109, %88 : vector<8x128xf32>
    %111 = math.exp %110 : vector<8x128xf32>
    %112 = arith.mulf %107, %111 : vector<8x128xf32>
    %cst_51 = arith.constant 1.000000e+00 : f32
    %113 = vector.broadcast %cst_51 : f32 to vector<8x128xf32>
    %114 = arith.subf %113, %112 : vector<8x128xf32>
    %cst_52 = arith.constant 0.000000e+00 : f32
    %115 = vector.broadcast %cst_52 : f32 to vector<8x128xf32>
    %116 = arith.cmpf oge, %87, %115 : vector<8x128xf32>
    %cst_53 = arith.constant 0.000000e+00 : f32
    %117 = vector.broadcast %cst_53 : f32 to vector<8x128xf32>
    %118 = arith.subf %117, %114 : vector<8x128xf32>
    %119 = arith.select %116, %114, %118 : vector<8x128xi1>, vector<8x128xf32>
    %cst_54 = arith.constant 5.000000e-01 : f32
    %120 = vector.broadcast %cst_54 : f32 to vector<8x128xf32>
    %121 = arith.mulf %120, %85 : vector<8x128xf32>
    %cst_55 = arith.constant 1.000000e+00 : f32
    %122 = vector.broadcast %cst_55 : f32 to vector<8x128xf32>
    %123 = arith.addf %122, %119 : vector<8x128xf32>
    %124 = arith.mulf %121, %123 : vector<8x128xf32>
    %c0_56 = arith.constant 0 : index
    %c1 = arith.constant 1 : index
    %c0_57 = arith.constant 0 : index
    %c0_58 = arith.constant 0 : index
    %125 = vector.load %arg11[%c0_56, %c1, %c0_57, %c0_58] : memref<1x4x8x128xf32, #tpu.memory_space<vmem>>, vector<1x1x8x128xf32>
    %126 = vector.shape_cast %125 : vector<1x1x8x128xf32> to vector<8x128xf32>
    %127 = vector.shape_cast %124 : vector<8x128xf32> to vector<1x1x8x128xf32>
    tpu.vector_store %arg11[%c0_56, %c1, %c0_57, %c0_58], %127 {strides = array<i32>} : memref<1x4x8x128xf32, #tpu.memory_space<vmem>>, vector<1x1x8x128xf32>,
    %128 = vector.broadcast %34 : vector<8x1xf32> to vector<8x128xf32>
    %129 = arith.mulf %27, %128 : vector<8x128xf32>
    %130 = vector.broadcast %35 : vector<8x1xf32> to vector<8x128xf32>
    %131 = arith.addf %129, %130 : vector<8x128xf32>
    %cst_59 = arith.constant 0.707106769 : f32
    %132 = vector.broadcast %cst_59 : f32 to vector<8x128xf32>
    %133 = arith.mulf %131, %132 : vector<8x128xf32>
    %134 = math.absf %133 : vector<8x128xf32>
    %cst_60 = arith.constant 0.327591091 : f32
    %135 = vector.broadcast %cst_60 : f32 to vector<8x128xf32>
    %136 = arith.mulf %135, %134 : vector<8x128xf32>
    %cst_61 = arith.constant 1.000000e+00 : f32
    %137 = vector.broadcast %cst_61 : f32 to vector<8x128xf32>
    %138 = arith.addf %137, %136 : vector<8x128xf32>
    %139 = tpu.reciprocal %138 {approx = true} : vector<8x128xf32> -> vector<8x128xf32>
    %cst_62 = arith.constant 1.06140542 : f32
    %140 = vector.broadcast %cst_62 : f32 to vector<8x128xf32>
    %141 = arith.mulf %139, %140 : vector<8x128xf32>
    %cst_63 = arith.constant -1.45315206 : f32
    %142 = vector.broadcast %cst_63 : f32 to vector<8x128xf32>
    %143 = arith.addf %142, %141 : vector<8x128xf32>
    %144 = arith.mulf %139, %143 : vector<8x128xf32>
    %cst_64 = arith.constant 1.42141378 : f32
    %145 = vector.broadcast %cst_64 : f32 to vector<8x128xf32>
    %146 = arith.addf %145, %144 : vector<8x128xf32>
    %147 = arith.mulf %139, %146 : vector<8x128xf32>
    %cst_65 = arith.constant -0.284496725 : f32
    %148 = vector.broadcast %cst_65 : f32 to vector<8x128xf32>
    %149 = arith.addf %148, %147 : vector<8x128xf32>
    %150 = arith.mulf %139, %149 : vector<8x128xf32>
    %cst_66 = arith.constant 0.254829586 : f32
    %151 = vector.broadcast %cst_66 : f32 to vector<8x128xf32>
    %152 = arith.addf %151, %150 : vector<8x128xf32>
    %153 = arith.mulf %139, %152 : vector<8x128xf32>
    %cst_67 = arith.constant 0.000000e+00 : f32
    %154 = vector.broadcast %cst_67 : f32 to vector<8x128xf32>
    %155 = arith.subf %154, %134 : vector<8x128xf32>
    %156 = arith.mulf %155, %134 : vector<8x128xf32>
    %157 = math.exp %156 : vector<8x128xf32>
    %158 = arith.mulf %153, %157 : vector<8x128xf32>
    %cst_68 = arith.constant 1.000000e+00 : f32
    %159 = vector.broadcast %cst_68 : f32 to vector<8x128xf32>
    %160 = arith.subf %159, %158 : vector<8x128xf32>
    %cst_69 = arith.constant 0.000000e+00 : f32
    %161 = vector.broadcast %cst_69 : f32 to vector<8x128xf32>
    %162 = arith.cmpf oge, %133, %161 : vector<8x128xf32>
    %cst_70 = arith.constant 0.000000e+00 : f32
    %163 = vector.broadcast %cst_70 : f32 to vector<8x128xf32>
    %164 = arith.subf %163, %160 : vector<8x128xf32>
    %165 = arith.select %162, %160, %164 : vector<8x128xi1>, vector<8x128xf32>
    %cst_71 = arith.constant 5.000000e-01 : f32
    %166 = vector.broadcast %cst_71 : f32 to vector<8x128xf32>
    %167 = arith.mulf %166, %131 : vector<8x128xf32>
    %cst_72 = arith.constant 1.000000e+00 : f32
    %168 = vector.broadcast %cst_72 : f32 to vector<8x128xf32>
    %169 = arith.addf %168, %165 : vector<8x128xf32>
    %170 = arith.mulf %167, %169 : vector<8x128xf32>
    %c0_73 = arith.constant 0 : index
    %c2 = arith.constant 2 : index
    %c0_74 = arith.constant 0 : index
    %c0_75 = arith.constant 0 : index
    %171 = vector.load %arg11[%c0_73, %c2, %c0_74, %c0_75] : memref<1x4x8x128xf32, #tpu.memory_space<vmem>>, vector<1x1x8x128xf32>
    %172 = vector.shape_cast %171 : vector<1x1x8x128xf32> to vector<8x128xf32>
    %173 = vector.shape_cast %170 : vector<8x128xf32> to vector<1x1x8x128xf32>
    tpu.vector_store %arg11[%c0_73, %c2, %c0_74, %c0_75], %173 {strides = array<i32>} : memref<1x4x8x128xf32, #tpu.memory_space<vmem>>, vector<1x1x8x128xf32>,
    %174 = vector.broadcast %34 : vector<8x1xf32> to vector<8x128xf32>
    %175 = arith.mulf %33, %174 : vector<8x128xf32>
    %176 = vector.broadcast %35 : vector<8x1xf32> to vector<8x128xf32>
    %177 = arith.addf %175, %176 : vector<8x128xf32>
    %cst_76 = arith.constant 0.707106769 : f32
    %178 = vector.broadcast %cst_76 : f32 to vector<8x128xf32>
    %179 = arith.mulf %177, %178 : vector<8x128xf32>
    %180 = math.absf %179 : vector<8x128xf32>
    %cst_77 = arith.constant 0.327591091 : f32
    %181 = vector.broadcast %cst_77 : f32 to vector<8x128xf32>
    %182 = arith.mulf %181, %180 : vector<8x128xf32>
    %cst_78 = arith.constant 1.000000e+00 : f32
    %183 = vector.broadcast %cst_78 : f32 to vector<8x128xf32>
    %184 = arith.addf %183, %182 : vector<8x128xf32>
    %185 = tpu.reciprocal %184 {approx = true} : vector<8x128xf32> -> vector<8x128xf32>
    %cst_79 = arith.constant 1.06140542 : f32
    %186 = vector.broadcast %cst_79 : f32 to vector<8x128xf32>
    %187 = arith.mulf %185, %186 : vector<8x128xf32>
    %cst_80 = arith.constant -1.45315206 : f32
    %188 = vector.broadcast %cst_80 : f32 to vector<8x128xf32>
    %189 = arith.addf %188, %187 : vector<8x128xf32>
    %190 = arith.mulf %185, %189 : vector<8x128xf32>
    %cst_81 = arith.constant 1.42141378 : f32
    %191 = vector.broadcast %cst_81 : f32 to vector<8x128xf32>
    %192 = arith.addf %191, %190 : vector<8x128xf32>
    %193 = arith.mulf %185, %192 : vector<8x128xf32>
    %cst_82 = arith.constant -0.284496725 : f32
    %194 = vector.broadcast %cst_82 : f32 to vector<8x128xf32>
    %195 = arith.addf %194, %193 : vector<8x128xf32>
    %196 = arith.mulf %185, %195 : vector<8x128xf32>
    %cst_83 = arith.constant 0.254829586 : f32
    %197 = vector.broadcast %cst_83 : f32 to vector<8x128xf32>
    %198 = arith.addf %197, %196 : vector<8x128xf32>
    %199 = arith.mulf %185, %198 : vector<8x128xf32>
    %cst_84 = arith.constant 0.000000e+00 : f32
    %200 = vector.broadcast %cst_84 : f32 to vector<8x128xf32>
    %201 = arith.subf %200, %180 : vector<8x128xf32>
    %202 = arith.mulf %201, %180 : vector<8x128xf32>
    %203 = math.exp %202 : vector<8x128xf32>
    %204 = arith.mulf %199, %203 : vector<8x128xf32>
    %cst_85 = arith.constant 1.000000e+00 : f32
    %205 = vector.broadcast %cst_85 : f32 to vector<8x128xf32>
    %206 = arith.subf %205, %204 : vector<8x128xf32>
    %cst_86 = arith.constant 0.000000e+00 : f32
    %207 = vector.broadcast %cst_86 : f32 to vector<8x128xf32>
    %208 = arith.cmpf oge, %179, %207 : vector<8x128xf32>
    %cst_87 = arith.constant 0.000000e+00 : f32
    %209 = vector.broadcast %cst_87 : f32 to vector<8x128xf32>
    %210 = arith.subf %209, %206 : vector<8x128xf32>
    %211 = arith.select %208, %206, %210 : vector<8x128xi1>, vector<8x128xf32>
    %cst_88 = arith.constant 5.000000e-01 : f32
    %212 = vector.broadcast %cst_88 : f32 to vector<8x128xf32>
    %213 = arith.mulf %212, %177 : vector<8x128xf32>
    %cst_89 = arith.constant 1.000000e+00 : f32
    %214 = vector.broadcast %cst_89 : f32 to vector<8x128xf32>
    %215 = arith.addf %214, %211 : vector<8x128xf32>
    %216 = arith.mulf %213, %215 : vector<8x128xf32>
    %c0_90 = arith.constant 0 : index
    %c3 = arith.constant 3 : index
    %c0_91 = arith.constant 0 : index
    %c0_92 = arith.constant 0 : index
    %217 = vector.load %arg11[%c0_90, %c3, %c0_91, %c0_92] : memref<1x4x8x128xf32, #tpu.memory_space<vmem>>, vector<1x1x8x128xf32>
    %218 = vector.shape_cast %217 : vector<1x1x8x128xf32> to vector<8x128xf32>
    %219 = vector.shape_cast %216 : vector<8x128xf32> to vector<1x1x8x128xf32>
    tpu.vector_store %arg11[%c0_90, %c3, %c0_91, %c0_92], %219 {strides = array<i32>} : memref<1x4x8x128xf32, #tpu.memory_space<vmem>>, vector<1x1x8x128xf32>,
    return
  }
  func.func @transform_0(%arg0: i32, %arg1: i32) -> (i32, i32, i32) {
    %c0_i32 = arith.constant 0 : i32
    %c0_i32_0 = arith.constant 0 : i32
    return %arg0, %c0_i32, %arg1 : i32, i32, i32
  }
  func.func @transform_1(%arg0: i32, %arg1: i32) -> (i32, i32, i32, i32) {
    %c0_i32 = arith.constant 0 : i32
    %c0_i32_0 = arith.constant 0 : i32
    %c0_i32_1 = arith.constant 0 : i32
    return %arg0, %arg1, %c0_i32, %c0_i32_0 : i32, i32, i32, i32
  }
  func.func @transform_2(%arg0: i32, %arg1: i32) -> (i32, i32) {
    %c0_i32 = arith.constant 0 : i32
    %c0_i32_0 = arith.constant 0 : i32
    %c0_i32_1 = arith.constant 0 : i32
    return %c0_i32, %c0_i32_0 : i32, i32
  }
  func.func @transform_3(%arg0: i32, %arg1: i32) -> (i32, i32) {
    %c0_i32 = arith.constant 0 : i32
    %c0_i32_0 = arith.constant 0 : i32
    %c0_i32_1 = arith.constant 0 : i32
    return %c0_i32, %c0_i32_0 : i32, i32
  }
  func.func @transform_4(%arg0: i32, %arg1: i32) -> (i32, i32) {
    %c0_i32 = arith.constant 0 : i32
    %c0_i32_0 = arith.constant 0 : i32
    %c0_i32_1 = arith.constant 0 : i32
    return %c0_i32, %c0_i32_0 : i32, i32
  }
  func.func @transform_5(%arg0: i32, %arg1: i32) -> (i32, i32) {
    %c0_i32 = arith.constant 0 : i32
    %c0_i32_0 = arith.constant 0 : i32
    %c0_i32_1 = arith.constant 0 : i32
    return %c0_i32, %c0_i32_0 : i32, i32
  }
  func.func @transform_6(%arg0: i32, %arg1: i32) -> (i32, i32) {
    %c0_i32 = arith.constant 0 : i32
    %c0_i32_0 = arith.constant 0 : i32
    %c0_i32_1 = arith.constant 0 : i32
    return %c0_i32, %c0_i32_0 : i32, i32
  }
  func.func @transform_7(%arg0: i32, %arg1: i32) -> (i32, i32) {
    %c0_i32 = arith.constant 0 : i32
    %c0_i32_0 = arith.constant 0 : i32
    %c0_i32_1 = arith.constant 0 : i32
    return %c0_i32, %c0_i32_0 : i32, i32
  }
  func.func @transform_8(%arg0: i32, %arg1: i32) -> (i32, i32) {
    %c0_i32 = arith.constant 0 : i32
    %c0_i32_0 = arith.constant 0 : i32
    %c0_i32_1 = arith.constant 0 : i32
    return %c0_i32, %c0_i32_0 : i32, i32
  }
  func.func @transform_9(%arg0: i32, %arg1: i32) -> (i32, i32, i32, i32) {
    %c0_i32 = arith.constant 0 : i32
    %c0_i32_0 = arith.constant 0 : i32
    %c0_i32_1 = arith.constant 0 : i32
    return %arg0, %c0_i32, %c0_i32_0, %arg1 : i32, i32, i32, i32
  }
}

</mosaic_0001>

<bundles_post_ra>
// kernel: tpu_custom_call.1
= control target key start
LH: loop header
LB: loop body
LE: loop exit
PB: predicated region body
PF: predicated region fallthrough
CT: control target
= control target key end

     0   :  { %14 = vsyncpa [#allocation3], 0  ;;  %s1556_s0 = inlined_call_operand.vmem [shape: f32[2,4,256], index: 0, kind: input, shape index: {}]   ;;  %s1557_s1 = inlined_call_operand.vmem [shape: f32[2,2,4,16], index: 1, kind: input, shape index: {}]   ;;  %s1558_s2 = inlined_call_operand.vmem [shape: f32[32,4], index: 2, kind: input, shape index: {}]   ;;  %s1559_s3 = inlined_call_operand.vmem [shape: f32[16,4], index: 3, kind: input, shape index: {}]   ;;  %s1560_s4 = inlined_call_operand.vmem [shape: f32[16,4], index: 4, kind: input, shape index: {}]   ;;  %s1561_s5 = inlined_call_operand.vmem [shape: f32[8,4], index: 5, kind: input, shape index: {}]   ;;  %s1562_s6 = inlined_call_operand.vmem [shape: f32[8,1], index: 6, kind: input, shape index: {}]   ;;  %s1563_s7 = inlined_call_operand.vmem [shape: f32[8,1], index: 7, kind: input, shape index: {}]   ;;  %s1564_s8 = inlined_call_operand.vmem [shape: f32[1,128], index: 8, kind: input, shape index: {}]   ;;  %s1565_s9 = inlined_call_operand.hbm [shape: f32[2,4,8,256], index: 9, kind: output, shape index: {}]  }
   0x1   :  { %16 = vsyncpa [#allocation3 + $0x1], 0  ;;  %s1334_s30 = smov 0   ;;  %s1336_s10 = smov 0  }
   0x2   :  { %s1338_s11 = smov 0   ;;  %s1340_s12 = smov 0  }
   0x3   :  { %s1342_s13 = smov 0   ;;  %s1344_s14 = smov 0  }
   0x4   :  { %s1346_s15 = smov 0   ;;  %s1348_s16 = smov 0  }
   0x5 LB: > { %1572 = sst [smem:[#allocation5_spill]] %s1253_s11  ;;  %s1016_s17 = sadd.s32 4294967295, %s1273_s16   ;;  %s1273_s16 = sphi %s1348_s16, %s22_s16   ;;  %s1269_s15 = sphi %s1346_s15, %s1590_s15   ;;  %s1265_s14 = sphi %s1344_s14, %s1586_s14   ;;  %s1261_s13 = sphi %s1342_s13, %s1585_s13   ;;  %s1257_s12 = sphi %s1340_s12, %s1584_s12   ;;  %s1253_s11 = sphi %s1338_s11, %s1583_s11   ;;  %s1249_s10 = sphi %s1336_s10, %s1589_s10   ;;  %s1245_s30 = sphi %s1334_s30, %s1588_s30  }
   0x6   : > { %1573 = sst [smem:[#allocation6_spill]] %s1265_s14  ;;  %s1017_s18 = sadd.s32 4294967294, %s1273_s16  }
   0x7   : > { %1574 = sst [smem:[#allocation7_spill]] %s1269_s15  ;;  %s31_s19 = sadd.s32 1, %s1265_s14 }
   0x8   : > { %p32_p0 = scmp.ge.s32.totalorder %s31_s19, 2  ;;  %s34_s20 = sadd.s32 1, %s1269_s15 }
   0x9   : > { %p256_p1 = scmp.ne.s32.totalorder %s1253_s11, %s1249_s10  ;;  %p257_p2 = scmp.eq.s32.totalorder %s1016_s17, 3 }
   0xa   : > { %s1592_s19 = smov (%p32_p0, %s31_s19), 0  ;;  %s1594_s20 = smov (!%p32_p0, %s34_s20), %s1269_s15 }
   0xb   : > { %1575 = sst [smem:[#allocation8_spill]] %s1592_s19  ;;  %s242_s21 = ssub.s32 %s1265_s14, %s1592_s19 }
   0xc   : > { %p1385_p3 = por %p257_p2, %p256_p1  ;;  %p36_p4 = scmp.ge.s32.totalorder %s1594_s20, 2 }
   0xd   : > { %p262_p5 = scmp.ne.s32.totalorder %s1249_s10, %s1245_s30  ;;  %p263_p6 = scmp.eq.s32.totalorder %s1017_s18, 3 }
   0xe   : > { %p1020_p7 = scmp.ge.s32.totalorder %s1273_s16, 1  ;;  %s1596_s20 = smov (%p36_p4, %s1594_s20), 0 }
   0xf   : > { %1577 = sst [smem:[#allocation9_spill]] %s1596_s20  ;;  %p1394_p8 = por %p263_p6, %p262_p5 }
  0x10   : > { %p324_p9 = scmp.lt.s32.totalorder %s1273_s16, 5  ;;  %s241_s24 = ssub.s32 %s1269_s15, %s1596_s20 }
  0x11   : > { %s1578_s23 = scalar_select %p1394_p8, 1, 0 }
  0x12   : > { %s246_s25 = sadd.s32 1, %s1253_s11  ;;  %s243_s26 = sor.u32 %s242_s21, %s241_s24 }
  0x13   : > { %1579 = sst [smem:[#allocation10_spill]] %s1578_s23  ;;  %p325_p10 = pnand %p1020_p7, %p324_p9 }
  0x14   : > { %p244_p11 = scmp.eq.s32.totalorder %s243_s26, 0  ;;  %p371_p12 = scmp.lt.s32.totalorder (!%p325_p10), %s1261_s13, 1 }
  0x15   : > { %328 = sbr.rel (%p325_p10) target bundleno = 536 (0x218), region = 56  ;;  %p373_p13 = scmp.lt.s32.totalorder (!%p325_p10), %s1257_s12, 1 }
  0x16   : > { %s1403_s27 = scalar_select %p244_p11, %s1253_s11, %s246_s25  }
  0x17   : > { %s1275_s11 = smov (!%p325_p10), 112   ;;  %s1276_s23 = smov (!%p325_p10), 127  }
  0x18   : > { %1580 = sst [smem:[#allocation11_spill]] %s1403_s27  ;;  %s1280_s21 = smov (!%p325_p10), [#allocation2]  }
  0x19   : > { %s1185_s15 = sshll.u32 (!%p325_p10), %s1280_s21, 4  ;;  %s1186_s15 = int_to_ptr.vmem [resolvable:$false] %s1185_s15 }
  0x1a   : > { %vm416_vm0 = vcmask 31744   ;;  %v517_v0 = vld [vmem:[%s1559_s3] sm:$0xff]  ;;  %s372_s17 = scalar_select %p371_p12, %s1261_s13, 1  ;;  %vm429_vm1 = vcmask 1043456   ;;  %v413_v3 = vld [vmem:[%s1558_s2 + $0x8] sm:$0xff]  ;;  %v414_v5 = vld [vmem:[%s1558_s2 + $0x10] sm:$0xff] }
  0x1b   : > { %1071 = vmatprep.mubr.msk.f32.mxu1 %vm416_vm0, %v517_v0  ;;  %v412_v1 = vld [vmem:[%s1558_s2] sm:$0xff]  ;;  %s374_s24 = scalar_select %p373_p13, %s1257_s12, 1  ;;  %v415_v6 = vld [vmem:[%s1558_s2 + $0x18] sm:$0xff]  ;;  %v1277_v7 = vmov 0.0   ;;  %vm1278_vm2 = vmmov 0   ;;  %v1279_v9 = vmov 0  }
  0x1c   : > { %1063 = vmatprep.mubr.msk.f32.mxu0 %vm416_vm0, %v412_v1  ;;  %s1022_s25 = sshll.u32 %s372_s17, 1  ;;  %v771_v8 = vld [vmem:[%s1562_s6] sm:$0xff]  ;;  %1163 = vset.pattern.permute.xlu0 %v1279_v9  ;;  %vm407_vm3 = vcmask 916480   ;;  %v518_v14 = vld [vmem:[%s1559_s3 + $0x8] sm:$0xff]  ;;  %s1187_s19 = scalar_lea.vmem %s1186_s15, 1024 }
  0x1d   : > { %s376_s26 = sadd.s32 %s1022_s25, %s374_s24  ;;  %1164 = vset.pattern.permute.xlu1 %v1279_v9  ;;  %v1026_v10 = vld [vmem:[%s1564_s8] ss:$0 sm:$0xff]  ;;  %v604_v18 = vld [vmem:[%s1560_s4 + $0x8] sm:$0xff] }
  0x1e   : > { %s1023_s20 = sshll.u32 %s376_s26, 2  ;;  %v603_v16 = vld [vmem:[%s1560_s4] sm:$0xff] }
  0x1f   : > { %s378_s14 = scalar_lea.vmem %s1556_s0, %s1023_s20  ;;  %s386_s29 = scalar_lea.vmem %s1557_s1, %s1023_s20  ;;  %v772_v19 = vld [vmem:[%s1563_s7] sm:$0xff] }
  0x20   : > { %v387_v2 = vld [vmem:[%s378_s14] sm:$0xf]  ;;  %s368_s20 = sand.u32 1, %s1249_s10  }
  0x21   : > { %400 = vrot.lane.b32.xlu0 %v387_v2, %s1275_s11  ;;  %390 = vrot.lane.b32.xlu1 %v387_v2, %s1276_s23  ;;  %v388_v4 = vld [vmem:[%s386_s29] sm:$0xf]  ;;  %s1021_s27 = sshll.u32 %s368_s20, 5 }
  0x22   : > { %1061 = vmatprep.subr.msk.mxu0 %vm429_vm1, %v387_v2  ;;  %v689_v22 = vld [vmem:[%s1561_s5] sm:$0xff]  ;;  %s1478_s17 = scalar_lea.vmem [#allocation2], %s1021_s27 }
  0x23   : > { %1062 = vmatpush3.msk.msra.mxu0 %vm429_vm1, %v387_v2  ;;  %s917_s25 = sshll.u32 %s1478_s17, 4  ;;  %s1495_s25 = int_to_ptr.vmem [resolvable:$true] %s917_s25 }
  0x24   : > { %1064 = vmatmul.mubr.msk.f32.vlgmr.msra.gmra.mxu0 %vm416_vm0, %v413_v3  ;;  %1079 = vmatprep.subr.mxu0 %v1277_v7  ;;  %s1181_s18 = scalar_lea.vmem %s1495_s25, 512  ;;  %p1188_p4 = scmp.lt.s32.totalorder %s1495_s25, %s1186_s15 }
  0x25   : > { %404 = vrot.lane.b32.xlu0 %v388_v4, %s1275_s11  ;;  %1066 = vmatprep.mubr.msk.f32.mxu0 %vm416_vm0, %v414_v5  ;;  %s1044_s11 = sshll.u32 %s1261_s13, 3  ;;  %p1182_p0 = scmp.ne.s32.totalorder %s1495_s25, %s1181_s18 }
  0x26   : > { %s914_s24 = sadd.s32 %s1257_s12, %s1044_s11  ;;  %s1505_s12 = scalar_lea.sflag [#allocation3], %s368_s20 }
  0x27   : > { %s1045_s26 = sshll.u32 %s914_s24, 7  ;;  %p1183_p1 = pnand %p1182_p0, %p1385_p3 }
  0x28   : > { %1067 = vmatmul.mubr.msk.f32.gmra.mxu0 %vm416_vm0, %v415_v6  ;;  %s1500_s13 = scalar_lea.hbm %s1565_s9, %s1045_s26  ;;  %p1189_p5 = scmp.lt.s32.totalorder %s1187_s19, %s1181_s18 }
  0x29   : > { %1081 = vmatprep.mubr.msk.f32.mxu0 %vm1278_vm2, %v1277_v7  ;;  %775 = vperm.xlu0 %1163, %v771_v8   ;;  %p1184_p2 = pneg %p1183_p1 }
  0x2a   : > { %p1190_p6 = por %p1189_p5, %p1188_p4 }
  0x2c   : > { %p1191_p7 = pnand %p1190_p6, %p1184_p2 }
  0x93   : > { %v401_v11 = vpop.permute.xlu0 %400  ;;  %v391_v12 = vpop.permute.xlu1 %390 }
  0x94   : > { %v398_v13 = vmul.f32 %v1026_v10, %v391_v12 }
  0x96   : > { %1069 = vmatprep.subr.msk.mxu1 %vm429_vm1, %v398_v13 }
  0x97   : > { %v405_v15 = vpop.permute.xlu0 %404  ;;  %1070 = vmatpush3.msk.msra.mxu1 %vm429_vm1, %v398_v13 }
  0x98   : > { %v408_v17 = vsel %vm407_vm3, %v401_v11, %v405_v15  ;;  %1072 = vmatmul.mubr.msk.f32.vlgmr.msra.gmra.mxu1 %vm416_vm0, %v518_v14 }
  0x99   : > { %409 = vrot.lane.b32.xlu1 %v408_v17, %s1276_s23  ;;  %1074 = vmatprep.subr.msk.mxu1 %vm429_vm1, %v408_v17 }
  0x9a   : > { %1075 = vmatpush3.msk.msra.mxu1 %vm429_vm1, %v408_v17  ;;  %1076 = vmatprep.mubr.msk.f32.mxu1 %vm416_vm0, %v603_v16 }
  0x9c   : > { %1077 = vmatmul.mubr.msk.f32.vlgmr.msra.gmra.mxu1 %vm416_vm0, %v604_v18 }
  0x9d   : > { %781 = vperm.xlu1 %1164, %v772_v19  }
  0xa4   : > { %v1469_v24 = vpop.permute.xlu0 %775 }
  0xe4   : > { %v1065_v23 = vpop.f32.mrf.mxu0 }
  0xe6   : > { %v498_v25 = vpop.f32.mrf.mxu0 }
  0xe7   : > { %v778_v26 = vmul.f32 %v1469_v24, %v498_v25 }
  0xe8   : > { %v1068_v55 = vpop.f32.mrf.mxu0 }
  0xea   : > { %v508_v60 = vpop.f32.mrf.mxu0 }
 0x10b   : > { %v410_v20 = vpop.permute.xlu1 %409 }
 0x10c   : > { %v411_v21 = vmul.f32 %v1026_v10, %v410_v20 }
 0x10e   : > { %1080 = vmatpush3.msk.msra.mxu0 %vm429_vm1, %v411_v21 }
 0x10f   : > { %1082 = vmatmul.mubr.msk.f32.vlgmr.msra.gmra.mxu0 %vm416_vm0, %v689_v22 }
 0x118   : > { %v1472_v27 = vpop.permute.xlu1 %781 }
 0x119   : > { %v784_v28 = vadd.f32 %v1472_v27, %v778_v26 }
 0x11b   : > { %v785_v29 = vmul.f32 0.70710677, %v784_v28  ;;  %v808_v50 = vmul.f32 0.5, %v784_v28 }
 0x11d   : > { %v786_v30 = vand.u32 2147483647, %v785_v29  ;;  %vm805_vm4 = vcmp.ge.f32.partialorder %v785_v29, 0.0 }
 0x11f   : > { %v787_v31 = vmul.f32 0.3275911, %v786_v30  ;;  %v799_v33 = vsub.f32 0.0, %v786_v30 }
 0x121   : > { %v788_v32 = vadd.f32 1.0, %v787_v31  ;;  %v800_v34 = vmul.f32 %v799_v33, %v786_v30 }
 0x123   : > { %1165 = vrcp.f32 %v788_v32  ;;  %v801_v35 = vmul.f32 1.442695, %v800_v34 }
 0x125   : > { %1167 = vpow2.f32 %v801_v35 }
 0x130   : > { %v1166_v36 = vpop.eup %1165 }
 0x131   : > { %v790_v37 = vmul.f32 1.0614054, %v1166_v36 }
 0x132   : > { %v1168_v45 = vpop.eup %1167 }
 0x133   : > { %v791_v38 = vadd.f32 -1.4531521, %v790_v37 }
 0x135   : > { %v792_v39 = vmul.f32 %v1166_v36, %v791_v38 }
 0x137   : > { %v793_v40 = vadd.f32 1.4214138, %v792_v39 }
 0x139   : > { %v794_v41 = vmul.f32 %v1166_v36, %v793_v40 }
 0x13b   : > { %v795_v42 = vadd.f32 -0.28449672, %v794_v41 }
 0x13d   : > { %v796_v43 = vmul.f32 %v1166_v36, %v795_v42 }
 0x13f   : > { %v797_v44 = vadd.f32 0.2548296, %v796_v43 }
 0x141   : > { %v798_v46 = vmul.f32 %v1166_v36, %v797_v44 }
 0x143   : > { %v803_v47 = vmul.f32 %v1168_v45, %v798_v46 }
 0x145   : > { %v804_v48 = vsub.f32 1.0, %v803_v47 }
 0x147   : > { %v806_v49 = vsub.f32 0.0, %v804_v48 }
 0x149   : > { %v807_v51 = vsel %vm805_vm4, %v804_v48, %v806_v49 }
 0x14a   : > { %v809_v52 = vadd.f32 1.0, %v807_v51 }
 0x14c   : > { %v810_v53 = vmul.f32 %v809_v52, %v808_v50 }
 0x14e   : > { %811 = vst [vmem:[%s1478_s17] sm:$0xff] %v810_v53 }
 0x158   : > { %v1073_v54 = vpop.f32.mrf.mxu1 }
 0x159   : > { %v768_v56 = vadd.f32 %v1073_v54, %v1068_v55 }
 0x15a   : > { %v594_v57 = vpop.f32.mrf.mxu1 }
 0x15b   : > { %v766_v58 = vadd.f32 %v1065_v23, %v594_v57 }
 0x15c   : > { %v1078_v59 = vpop.f32.mrf.mxu1 }
 0x15d   : > { %v812_v61 = vmul.f32 %v1469_v24, %v766_v58  ;;  %v1482_v62 = vadd.f32 %v1078_v59, %v768_v56 }
 0x15e   : > { %v680_v63 = vpop.f32.mrf.mxu1 }
 0x15f   : > { %v813_v0 = vadd.f32 %v812_v61, %v1472_v27  ;;  %v767_v1 = vadd.f32 %v680_v63, %v508_v60 }
 0x161   : > { %v814_v2 = vmul.f32 0.70710677, %v813_v0  ;;  %v842_v3 = vmul.f32 %v1469_v24, %v767_v1  ;;  %v837_v46 = vmul.f32 0.5, %v813_v0 }
 0x163   : > { %v815_v4 = vand.u32 2147483647, %v814_v2  ;;  %v843_v5 = vadd.f32 %v842_v3, %v1472_v27  ;;  %vm834_vm5 = vcmp.ge.f32.partialorder %v814_v2, 0.0 }
 0x165   : > { %v816_v6 = vmul.f32 0.3275911, %v815_v4  ;;  %v844_v7 = vmul.f32 0.70710677, %v843_v5  ;;  %v828_v12 = vsub.f32 0.0, %v815_v4  ;;  %v867_v52 = vmul.f32 0.5, %v843_v5 }
 0x167   : > { %v817_v8 = vadd.f32 1.0, %v816_v6  ;;  %v845_v9 = vand.u32 2147483647, %v844_v7  ;;  %v829_v13 = vmul.f32 %v828_v12, %v815_v4  ;;  %vm864_vm6 = vcmp.ge.f32.partialorder %v844_v7, 0.0 }
 0x169   : > { %1169 = vrcp.f32 %v817_v8  ;;  %v846_v10 = vmul.f32 0.3275911, %v845_v9  ;;  %v858_v14 = vsub.f32 0.0, %v845_v9  ;;  %v830_v15 = vmul.f32 1.442695, %v829_v13 }
 0x16b   : > { %v847_v11 = vadd.f32 1.0, %v846_v10  ;;  %v859_v16 = vmul.f32 %v858_v14, %v845_v9 }
 0x16d   : > { %1171 = vrcp.f32 %v847_v11  ;;  %v860_v20 = vmul.f32 1.442695, %v859_v16 }
 0x16e   : > { %1173 = vpow2.f32 %v830_v15 }
 0x16f   : > { %1175 = vpow2.f32 %v860_v20 }
 0x176   : > { %v1170_v17 = vpop.eup %1169 }
 0x177   : > { %v819_v18 = vmul.f32 1.0614054, %v1170_v17 }
 0x179   : > { %v820_v19 = vadd.f32 -1.4531521, %v819_v18 }
 0x17a   : > { %v1172_v21 = vpop.eup %1171 }
 0x17b   : > { %v821_v22 = vmul.f32 %v1170_v17, %v820_v19  ;;  %v849_v23 = vmul.f32 1.0614054, %v1172_v21  ;;  %v1174_v36 = vpop.eup %1173 }
 0x17c   : > { %v1176_v41 = vpop.eup %1175 }
 0x17d   : > { %v822_v25 = vadd.f32 1.4214138, %v821_v22  ;;  %v850_v26 = vadd.f32 -1.4531521, %v849_v23 }
 0x17f   : > { %v823_v28 = vmul.f32 %v1170_v17, %v822_v25  ;;  %v851_v29 = vmul.f32 %v1172_v21, %v850_v26 }
 0x181   : > { %v824_v30 = vadd.f32 -0.28449672, %v823_v28  ;;  %v852_v31 = vadd.f32 1.4214138, %v851_v29 }
 0x183   : > { %v825_v32 = vmul.f32 %v1170_v17, %v824_v30  ;;  %v853_v33 = vmul.f32 %v1172_v21, %v852_v31 }
 0x185   : > { %v826_v34 = vadd.f32 0.2548296, %v825_v32  ;;  %v854_v35 = vadd.f32 -0.28449672, %v853_v33 }
 0x187   : > { %v827_v37 = vmul.f32 %v1170_v17, %v826_v34  ;;  %v855_v38 = vmul.f32 %v1172_v21, %v854_v35 }
 0x189   : > { %v832_v39 = vmul.f32 %v1174_v36, %v827_v37  ;;  %v856_v40 = vadd.f32 0.2548296, %v855_v38 }
 0x18b   : > { %v833_v42 = vsub.f32 1.0, %v832_v39  ;;  %v857_v43 = vmul.f32 %v1172_v21, %v856_v40 }
 0x18d   : > { %v835_v44 = vsub.f32 0.0, %v833_v42  ;;  %v862_v45 = vmul.f32 %v1176_v41, %v857_v43 }
 0x18f   : > { %v836_v47 = vsel %vm834_vm5, %v833_v42, %v835_v44  ;;  %v863_v48 = vsub.f32 1.0, %v862_v45 }
 0x190   : > { %v838_v49 = vadd.f32 1.0, %v836_v47 }
 0x191   : > { %v865_v50 = vsub.f32 0.0, %v863_v48 }
 0x192   : > { %v839_v51 = vmul.f32 %v838_v49, %v837_v46 }
 0x193   : > { %v866_v53 = vsel %vm864_vm6, %v863_v48, %v865_v50 }
 0x194   : > { %1040 = vst [vmem:[%s1478_s17 + $0x8] sm:$0xff] %v839_v51  ;;  %v868_v54 = vadd.f32 1.0, %v866_v53 }
 0x196   : > { %v869_v55 = vmul.f32 %v868_v54, %v867_v52 }
 0x198   : > { %1041 = vst [vmem:[%s1478_s17 + $0x10] sm:$0xff] %v869_v55 }
 0x1cf   : > { %v762_v56 = vpop.f32.mrf.mxu0 }
 0x1d0   : > { %v770_v57 = vadd.f32 %v1482_v62, %v762_v56 }
 0x1d1   : > { %v1083_v58 = vpop.f32.mrf.mxu0 }
 0x1d2   : > { %v872_v59 = vmul.f32 %v1469_v24, %v770_v57 }
 0x1d4   : > { %v873_v60 = vadd.f32 %v872_v59, %v1472_v27 }
 0x1d6   : > { %v874_v61 = vmul.f32 0.70710677, %v873_v60  ;;  %v897_v17 = vmul.f32 0.5, %v873_v60 }
 0x1d8   : > { %v875_v63 = vand.u32 2147483647, %v874_v61  ;;  %vm894_vm7 = vcmp.ge.f32.partialorder %v874_v61, 0.0 }
 0x1da   : > { %v876_v0 = vmul.f32 0.3275911, %v875_v63  ;;  %v888_v2 = vsub.f32 0.0, %v875_v63 }
 0x1dc   : > { %v877_v1 = vadd.f32 1.0, %v876_v0  ;;  %v889_v3 = vmul.f32 %v888_v2, %v875_v63 }
 0x1de   : > { %1177 = vrcp.f32 %v877_v1  ;;  %v890_v6 = vmul.f32 1.442695, %v889_v3 }
 0x1e0   : > { %1179 = vpow2.f32 %v890_v6 }
 0x1eb   : > { %v1178_v4 = vpop.eup %1177 }
 0x1ec   : > { %v879_v5 = vmul.f32 1.0614054, %v1178_v4 }
 0x1ed   : > { %v1180_v12 = vpop.eup %1179 }
 0x1ee   : > { %v880_v7 = vadd.f32 -1.4531521, %v879_v5 }
 0x1f0   : > { %v881_v62 = vmul.f32 %v1178_v4, %v880_v7 }
 0x1f2   : > { %v882_v8 = vadd.f32 1.4214138, %v881_v62 }
 0x1f4   : > { %v883_v24 = vmul.f32 %v1178_v4, %v882_v8 }
 0x1f6   : > { %v884_v9 = vadd.f32 -0.28449672, %v883_v24 }
 0x1f8   : > { %v885_v27 = vmul.f32 %v1178_v4, %v884_v9 }
 0x1fa   : > { %v886_v10 = vadd.f32 0.2548296, %v885_v27 }
 0x1fc   : > { %v887_v11 = vmul.f32 %v1178_v4, %v886_v10 }
 0x1fe   : > { %v892_v13 = vmul.f32 %v1180_v12, %v887_v11 }
 0x200   : > { %v893_v14 = vsub.f32 1.0, %v892_v13 }
 0x202   : > { %v895_v15 = vsub.f32 0.0, %v893_v14 }
 0x204   : > { %v896_v16 = vsel %vm894_vm7, %v893_v14, %v895_v15 }
 0x205   : > { %v898_v18 = vadd.f32 1.0, %v896_v16 }
 0x207   : > { %v899_v19 = vmul.f32 %v898_v18, %v897_v17 }
 0x209   : > { %1042 = vst [vmem:[%s1478_s17 + $0x18] sm:$0xff] %v899_v19 }
 0x20a   : > { %1194 = shalt.err (!%p1191_p7)
}
 0x20b   : > { %s1195_s23 = scalar_lea.hbm %s1500_s13, 512  ;;  %s1199_s27 = scalar_lea.hbm %s1565_s9, 2048 }
 0x20c   : > { %p1196_p9 = scmp.ne.s32.totalorder %s1500_s13, %s1195_s23  ;;  %p1200_p12 = scmp.lt.s32.totalorder %s1500_s13, %s1565_s9 }
 0x20d   : > { %p1201_p13 = scmp.lt.s32.totalorder %s1199_s27, %s1195_s23 }
 0x20e   : > { %p1197_p10 = pnand %p1196_p9, %p1385_p3 }
 0x20f   : > { %p1202_p0 = por %p1201_p13, %p1200_p12 }
 0x210   : > { %p1198_p11 = pneg %p1197_p10 }
 0x212   : > { %p1203_p1 = pnand %p1202_p0, %p1198_p11 }
 0x214   : > { %1206 = shalt.err (!%p1203_p1)
}
 0x215   : > { %s1281_s24 = smov 128   ;;  %s1282_s26 = smov 256  }
 0x216   : > { %s1283_s28 = smov 8  }
 0x217   : > { %1084 = dma.vmem_to_hbm [thread:$0]  (%p1385_p3), %s1495_s25, 512, %s1500_s13, %s1505_s12, %s1281_s24, %s1282_s26, %s1283_s28  }
 0x218 PF: > { %p1090_p2 = scmp.ge.s32.totalorder %s1273_s16, 2  ;;  %s932_s18 = sand.u32 1, %s1245_s30  }
 0x219   : > { %s933_s21 = scalar_lea.sflag [#allocation3], %s932_s18 }
 0x21a   : > { %p1087_p4 = pnand %p1090_p2, %p1394_p8 }
 0x21c   : > { %p1088_p5 = pneg %p1087_p4 }
 0x21e   : > { %1240 = dma.done.wait (%p1088_p5), %s933_s21, 512  }
 0x21f   : > { %1242 = vsyncadd (%p1088_p5), %s933_s21, 4294966784  ;;  %s22_s16 = sadd.s32 1, %s1273_s16   ;;  %s1582_s15 = sld [smem:[#allocation5_spill]] }
 0x220   : > { %p19_p6 = scmp.ge.s32.totalorder %s22_s16, 6   ;;  %s1583_s11 = sld [smem:[#allocation11_spill]] }
 0x221   : > { %s1584_s12 = sld [smem:[#allocation6_spill]]  ;;  %s1588_s30 = smov %s1249_s10 }
 0x222   : > { %s1585_s13 = sld [smem:[#allocation7_spill]] }
 0x223   : > { %s1586_s14 = sld [smem:[#allocation8_spill]] }
 0x224   : > { %s1587_s22 = sld [smem:[#allocation9_spill]] }
 0x225   : > { %s1589_s10 = smov %s1582_s15 }
 0x226   :  { %21 = sbr.rel (!%p19_p6) target bundleno = 5 (0x5), region = 97 }
 0x22a   : > { %s1590_s15 = smov %s1587_s22 }
 0x22b   :  { %938 = vsyncpa [#allocation3], 1 }
 0x22c   :  { %940 = vsyncpa [#allocation3 + $0x1], 1 }

</bundles_post_ra>
